<compile_context>
chip_gen: v6e
topology: v6e:2x2x1
jax: 0.10.0
libtpu: 0.0.40
codegen_flags: <defaults>
</compile_context>

<pallas_src>
import functools

import numpy as np
import jax
import jax.numpy as jnp
from jax import lax
from jax.experimental import pallas as pl
from jax.experimental.pallas import tpu as pltpu


def _triplet_loss_kernel(trip_ref, emb_hbm_ref, out_ref, emb_vmem, copy_sem, *, margin):
    """One grid step: gather a tile of triplets and accumulate the loss sum.

    trip_ref   : (TT, 3) int32   triplet indices for this tile (padded rows are (0,0,0))
    emb_hbm_ref: (N, D)          embeddings left in HBM (memory_space=pl.ANY)
    out_ref    : (1, 8, 128) f32 per-core partial sum (every element holds the sum)
    emb_vmem   : (N, D)          single-buffered VMEM copy of the embeddings
    copy_sem   : DMA semaphore for the one-time embedding copy
    """
    t = pl.program_id(1)  # inner ("arbitrary") reduction axis

    @pl.when(t == 0)
    def _():
        cp = pltpu.make_async_copy(emb_hbm_ref, emb_vmem, copy_sem)
        cp.start()
        cp.wait()
        out_ref[...] = jnp.zeros_like(out_ref)

    tt = trip_ref.shape[0]
    n = emb_vmem.shape[0]
    cdtype = emb_vmem.dtype

    emb = emb_vmem[...]                                          # (N, D) compute dtype
    col_iota = lax.broadcasted_iota(jnp.int32, (tt, n), 1)       # (TT, N)

    # Stacked one-hot gather: a-rows, p-rows, n-rows -> one MXU matmul.
    oh_a = (trip_ref[:, 0:1] == col_iota).astype(cdtype)         # (TT, N)
    oh_p = (trip_ref[:, 1:2] == col_iota).astype(cdtype)
    oh_n = (trip_ref[:, 2:3] == col_iota).astype(cdtype)
    one_hot = jnp.concatenate([oh_a, oh_p, oh_n], axis=0)        # (3*TT, N)

    g = jnp.dot(one_hot, emb, preferred_element_type=jnp.float32)  # (3*TT, D) f32
    a_emb = g[0:tt]
    p_emb = g[tt:2 * tt]
    n_emb = g[2 * tt:3 * tt]

    ap = jnp.sum((a_emb - p_emb) ** 2, axis=1, keepdims=True)    # (TT, 1)
    an = jnp.sum((a_emb - n_emb) ** 2, axis=1, keepdims=True)    # (TT, 1)
    losses = jnp.maximum(ap - an + jnp.float32(margin), 0.0)

    # Scalar step-sum broadcast-accumulated into the lane-dense (1,8,128) block.
    out_ref[...] += jnp.sum(losses)


def _round_up(x, m):
    return ((x + m - 1) // m) * m


def online_triplet_loss(embeddings, triplets, margin, *, tile=512, num_cores=2,
                        compute_dtype=jnp.bfloat16):
    """Pallas-backed OnlineTripletLoss.forward.

    embeddings: (N, D) float32
    triplets:   (T, 3) int32 (anchor, positive, negative) indices
    Returns (mean_loss, num_triplets), matching the PyTorch module.
    """
    N, D = embeddings.shape
    T = int(triplets.shape[0])
    if T == 0:
        # PyTorch: mean of an empty tensor is NaN; len(triplets) == 0.
        return jnp.float32(float("nan")), 0

    # Tile is a triplet-row count; keep it a multiple of 128, don't over-pad tiny T.
    tile = max(128, min(int(tile), _round_up(T, 128)))
    t_pad = _round_up(T, tile * num_cores)
    n_inner = t_pad // (tile * num_cores)

    trip_padded = jnp.zeros((t_pad, 3), jnp.int32).at[:T].set(triplets.astype(jnp.int32))
    emb = embeddings.astype(compute_dtype)

    kernel = functools.partial(_triplet_loss_kernel, margin=float(margin))

    # Explicit scoped-VMEM budget (v5e default is only 16 MiB).
    itemsize = jnp.dtype(compute_dtype).itemsize
    est = (N * D * itemsize                       # resident embeddings (single-buffered)
           + 2 * tile * 3 * 4                     # double-buffered index tiles
           + 2 * 8 * 128 * 4                      # output accumulator block
           + 2 * (3 * tile * N * itemsize)        # stacked one-hot intermediate
           + 4 * (3 * tile * D * 4))              # gathered rows + diffs (f32)
    vmem_limit = int(min(64 * 2 ** 20, max(2 * est + (4 << 20), 32 * 2 ** 20)))

    partials = pl.pallas_call(
        kernel,
        out_shape=jax.ShapeDtypeStruct((num_cores, 8, 128), jnp.float32),
        grid_spec=pltpu.PrefetchScalarGridSpec(
            num_scalar_prefetch=0,
            grid=(num_cores, n_inner),
            in_specs=[
                pl.BlockSpec((tile, 3), lambda p, t: (p * n_inner + t, 0)),  # triplet tile
                pl.BlockSpec(memory_space=pl.ANY),                           # embeddings in HBM
            ],
            out_specs=pl.BlockSpec((1, 8, 128), lambda p, t: (p, 0, 0)),
            scratch_shapes=[
                pltpu.VMEM((N, D), compute_dtype),   # single-buffered resident embeddings
                pltpu.SemaphoreType.DMA(()),
            ],
        ),
        compiler_params=pltpu.CompilerParams(
            dimension_semantics=("parallel", "arbitrary"),
            vmem_limit_bytes=vmem_limit,
        ),
    )(trip_padded, emb)

    # Each element of a core's (8,128) block holds that core's partial sum.
    total = jnp.sum(partials[:, 0, 0])
    # Padded triplets are (0,0,0): a==p==n -> each contributes exactly relu(margin).
    total = total - jnp.float32(t_pad - T) * jnp.float32(max(float(margin), 0.0))
    return total / jnp.float32(T), T


# TODO(synk): only the AllTripletSelector bookkeeping is reproduced host-side;
# hard/semi-hard negative selectors (distance-based mining) stay outside the kernel.
def _all_triplets(labels):
    """Plain-Python equivalent of AllTripletSelector.get_triplets (glue, not hot path)."""
    labels = np.asarray(labels)
    trips = []
    n = labels.shape[0]
    for a in range(n):
        for p in range(n):
            if a == p or labels[a] != labels[p]:
                continue
            for neg in range(n):
                if labels[neg] != labels[a]:
                    trips.append((a, p, neg))
    return jnp.asarray(np.array(trips, dtype=np.int32))


def _reference(embeddings, triplets, margin):
    a = embeddings[triplets[:, 0]]
    p = embeddings[triplets[:, 1]]
    n = embeddings[triplets[:, 2]]
    ap = jnp.sum((a - p) ** 2, axis=1)
    an = jnp.sum((a - n) ** 2, axis=1)
    return jnp.mean(jnp.maximum(ap - an + margin, 0.0))


if __name__ == "__main__":
    key = jax.random.PRNGKey(0)
    k1, k2 = jax.random.split(key)
    margin = 1.0

    # --- Test 1: batch of 8 embeddings, hidden dim 32, all-triplet selector (96 triplets).
    N, D = 8, 32
    labels = np.array([0, 0, 0, 0, 1, 1, 1, 1], dtype=np.int32)
    embeddings = jax.random.normal(k1, (N, D), dtype=jnp.float32)
    triplets = _all_triplets(labels)

    # Exact f32 path vs f32 reference.
    loss32, n_trip = online_triplet_loss(embeddings, triplets, margin,
                                         compute_dtype=jnp.float32)
    loss32 = jax.block_until_ready(loss32)
    ref32 = jax.block_until_ready(_reference(embeddings, triplets, margin))
    assert n_trip == triplets.shape[0]
    assert jnp.allclose(loss32, ref32, rtol=1e-5, atol=1e-5), (loss32, ref32)

    # Default bf16 gather path: exact w.r.t. bf16-rounded embeddings.
    loss_bf, _ = online_triplet_loss(embeddings, triplets, margin)
    loss_bf = jax.block_until_ready(loss_bf)
    ref_bf = jax.block_until_ready(
        _reference(embeddings.astype(jnp.bfloat16).astype(jnp.float32), triplets, margin))
    assert jnp.allclose(loss_bf, ref_bf, rtol=1e-4, atol=1e-4), (loss_bf, ref_bf)

    # --- Test 2: larger case exercising multi-tile accumulation + 2-way parallel axis.
    N2, D2 = 16, 64
    labels2 = np.array([0] * 8 + [1] * 8, dtype=np.int32)
    embeddings2 = jax.random.normal(k2, (N2, D2), dtype=jnp.float32)
    triplets2 = _all_triplets(labels2)                      # 896 triplets
    loss2, n2 = online_triplet_loss(embeddings2, triplets2, margin,
                                    tile=128, num_cores=2, compute_dtype=jnp.float32)
    loss2 = jax.block_until_ready(loss2)
    ref2 = jax.block_until_ready(_reference(embeddings2, triplets2, margin))
    assert n2 == triplets2.shape[0]
    assert jnp.allclose(loss2, ref2, rtol=1e-5, atol=1e-5), (loss2, ref2)

    print("KERNEL_OK")
</pallas_src>

<mosaic_0001>
module attributes {stable_mosaic.version = 11 : i64} {
  func.func @_triplet_loss_kernel(%arg0: i32, %arg1: i32, %arg2: memref<128x3xi32, #tpu.memory_space<vmem>>, %arg3: memref<8x32xf32, #tpu.memory_space<any>>, %arg4: memref<1x8x128xf32, #tpu.memory_space<vmem>>, %arg5: memref<8x32xf32, #tpu.memory_space<vmem>>, %arg6: memref<!tpu.dma_semaphore, #tpu.memory_space<semaphore_mem>>) attributes {dimension_semantics = [#tpu.dimension_semantics<parallel>, #tpu.dimension_semantics<arbitrary>], iteration_bounds = array<i64: 2, 1>, scalar_prefetch = 0 : i64, scratch_operands = 2 : i64, tpu.core_type = #tpu.core_type<tc>, window_params = [{transform_indices = @transform_0, window_bounds = array<i64: 128, 3>}, {}, {transform_indices = @transform_2, window_bounds = array<i64: 1, 8, 128>}]} {
    %c0_i32 = arith.constant 0 : i32
    %0 = arith.cmpi eq, %arg1, %c0_i32 : i32
    %1 = arith.extui %0 : i1 to i32
    %c0_i32_0 = arith.constant 0 : i32
    %2 = arith.cmpi ne, %1, %c0_i32_0 : i32
    scf.if %2 {
      tpu.enqueue_dma source(%arg3 : memref<8x32xf32, #tpu.memory_space<any>>) target(%arg5 : memref<8x32xf32, #tpu.memory_space<vmem>>) target_semaphore(%arg6 : memref<!tpu.dma_semaphore, #tpu.memory_space<semaphore_mem>>)
      tpu.wait_dma2 semaphore(%arg6 : memref<!tpu.dma_semaphore, #tpu.memory_space<semaphore_mem>>) src(%arg3 : memref<8x32xf32, #tpu.memory_space<any>>) dst(%arg5 : memref<8x32xf32, #tpu.memory_space<vmem>>)
      %cst_17 = arith.constant 0.000000e+00 : f32
      %46 = vector.broadcast %cst_17 : f32 to vector<1x8x128xf32>
      %c0_18 = arith.constant 0 : index
      %c0_19 = arith.constant 0 : index
      %c0_20 = arith.constant 0 : index
      %47 = vector.load %arg4[%c0_18, %c0_19, %c0_20] : memref<1x8x128xf32, #tpu.memory_space<vmem>>, vector<1x8x128xf32>
      tpu.vector_store %arg4[%c0_18, %c0_19, %c0_20], %46 {strides = array<i32>} : memref<1x8x128xf32, #tpu.memory_space<vmem>>, vector<1x8x128xf32>,
    } else {
    }
    %c0 = arith.constant 0 : index
    %c0_1 = arith.constant 0 : index
    %3 = vector.load %arg5[%c0, %c0_1] : memref<8x32xf32, #tpu.memory_space<vmem>>, vector<8x32xf32>
    %4 = tpu.iota {dimensions = array<i32: 1>} : vector<128x8xi32>
    %c0_2 = arith.constant 0 : index
    %c0_3 = arith.constant 0 : index
    %5 = vector.load %arg2[%c0_2, %c0_3] : memref<128x3xi32, #tpu.memory_space<vmem>>, vector<128x1xi32>
    %6 = vector.broadcast %5 : vector<128x1xi32> to vector<128x8xi32>
    %7 = arith.cmpi eq, %6, %4 : vector<128x8xi32>
    %8 = arith.extui %7 : vector<128x8xi1> to vector<128x8xi32>
    %9 = arith.sitofp %8 : vector<128x8xi32> to vector<128x8xf32>
    %c0_4 = arith.constant 0 : index
    %c1 = arith.constant 1 : index
    %10 = vector.load %arg2[%c0_4, %c1] : memref<128x3xi32, #tpu.memory_space<vmem>>, vector<128x1xi32>
    %11 = vector.broadcast %10 : vector<128x1xi32> to vector<128x8xi32>
    %12 = arith.cmpi eq, %11, %4 : vector<128x8xi32>
    %13 = arith.extui %12 : vector<128x8xi1> to vector<128x8xi32>
    %14 = arith.sitofp %13 : vector<128x8xi32> to vector<128x8xf32>
    %c0_5 = arith.constant 0 : index
    %c2 = arith.constant 2 : index
    %15 = vector.load %arg2[%c0_5, %c2] : memref<128x3xi32, #tpu.memory_space<vmem>>, vector<128x1xi32>
    %16 = vector.broadcast %15 : vector<128x1xi32> to vector<128x8xi32>
    %17 = arith.cmpi eq, %16, %4 : vector<128x8xi32>
    %18 = arith.extui %17 : vector<128x8xi1> to vector<128x8xi32>
    %19 = arith.sitofp %18 : vector<128x8xi32> to vector<128x8xf32>
    %20 = tpu.concatenate %9, %14, %19 in 0 : vector<128x8xf32>, vector<128x8xf32>, vector<128x8xf32> -> vector<384x8xf32>
    %cst = arith.constant dense<0.000000e+00> : vector<384x32xf32>
    %21 = tpu.matmul %20, %3, %cst {dimension_numbers = #tpu.dot_dimension_numbers<[1], [0], [0], [1], [0, 0, 1, 1], [], []>} : vector<384x8xf32>, vector<8x32xf32>, vector<384x32xf32> -> vector<384x32xf32>
    %22 = vector.extract_strided_slice %21 {offsets = [0, 0], sizes = [128, 32], strides = [1, 1]} : vector<384x32xf32> to vector<128x32xf32>
    %23 = vector.extract_strided_slice %21 {offsets = [128, 0], sizes = [128, 32], strides = [1, 1]} : vector<384x32xf32> to vector<128x32xf32>
    %24 = vector.extract_strided_slice %21 {offsets = [256, 0], sizes = [128, 32], strides = [1, 1]} : vector<384x32xf32> to vector<128x32xf32>
    %25 = arith.subf %22, %23 : vector<128x32xf32>
    %26 = arith.mulf %25, %25 : vector<128x32xf32>
    %cst_6 = arith.constant dense<0.000000e+00> : vector<128xf32>
    %27 = vector.multi_reduction <add>, %26, %cst_6 [1] : vector<128x32xf32> to vector<128xf32>
    %28 = vector.shape_cast %27 : vector<128xf32> to vector<128x1xf32>
    %29 = arith.subf %22, %24 : vector<128x32xf32>
    %30 = arith.mulf %29, %29 : vector<128x32xf32>
    %cst_7 = arith.constant dense<0.000000e+00> : vector<128xf32>
    %31 = vector.multi_reduction <add>, %30, %cst_7 [1] : vector<128x32xf32> to vector<128xf32>
    %32 = vector.shape_cast %31 : vector<128xf32> to vector<128x1xf32>
    %33 = arith.subf %28, %32 : vector<128x1xf32>
    %cst_8 = arith.constant 1.000000e+00 : f32
    %34 = vector.broadcast %cst_8 : f32 to vector<128x1xf32>
    %35 = arith.addf %33, %34 : vector<128x1xf32>
    %cst_9 = arith.constant 0.000000e+00 : f32
    %36 = vector.broadcast %cst_9 : f32 to vector<128x1xf32>
    %37 = arith.maximumf %35, %36 : vector<128x1xf32>
    %c0_10 = arith.constant 0 : index
    %c0_11 = arith.constant 0 : index
    %c0_12 = arith.constant 0 : index
    %38 = vector.load %arg4[%c0_10, %c0_11, %c0_12] : memref<1x8x128xf32, #tpu.memory_space<vmem>>, vector<1x8x128xf32>
    %39 = vector.shape_cast %37 : vector<128x1xf32> to vector<1x128x1xf32>
    %cst_13 = arith.constant dense<0.000000e+00> : vector<1xf32>
    %40 = vector.multi_reduction <add>, %39, %cst_13 [1, 2] : vector<1x128x1xf32> to vector<1xf32>
    %41 = vector.shape_cast %40 : vector<1xf32> to vector<1x1x1xf32>
    %42 = vector.extract %41[0, 0, 0] : f32 from vector<1x1x1xf32>
    %43 = vector.broadcast %42 : f32 to vector<1x8x128xf32>
    %44 = arith.addf %38, %43 : vector<1x8x128xf32>
    %c0_14 = arith.constant 0 : index
    %c0_15 = arith.constant 0 : index
    %c0_16 = arith.constant 0 : index
    %45 = vector.load %arg4[%c0_14, %c0_15, %c0_16] : memref<1x8x128xf32, #tpu.memory_space<vmem>>, vector<1x8x128xf32>
    tpu.vector_store %arg4[%c0_14, %c0_15, %c0_16], %44 {strides = array<i32>} : memref<1x8x128xf32, #tpu.memory_space<vmem>>, vector<1x8x128xf32>,
    return
  }
  func.func @transform_0(%arg0: i32, %arg1: i32) -> (i32, i32) {
    %c1_i32 = arith.constant 1 : i32
    %0 = arith.muli %arg0, %c1_i32 : i32
    %1 = arith.addi %0, %arg1 : i32
    %c0_i32 = arith.constant 0 : i32
    %c0_i32_0 = arith.constant 0 : i32
    return %1, %c0_i32 : i32, i32
  }
  func.func @transform_2(%arg0: i32, %arg1: i32) -> (i32, i32, i32) {
    %c0_i32 = arith.constant 0 : i32
    %c0_i32_0 = arith.constant 0 : i32
    %c0_i32_1 = arith.constant 0 : i32
    return %arg0, %c0_i32, %c0_i32_0 : i32, i32, i32
  }
}

</mosaic_0001>

<bundles_post_ra>
// kernel: tpu_custom_call.1
= control target key start
LH: loop header
LB: loop body
LE: loop exit
PB: predicated region body
PF: predicated region fallthrough
CT: control target
= control target key end

     0   :  { %7 = vsyncpa [#allocation5], 0  ;;  %s2102_s0 = inlined_call_operand.vmem [shape: s32[256,3], index: 0, kind: input, shape index: {}]   ;;  %s2103_s1 = inlined_call_operand.vmem [shape: f32[8,32], index: 1, kind: input, shape index: {}]   ;;  %s2104_s2 = inlined_call_operand.hbm [shape: f32[2,8,128], index: 2, kind: output, shape index: {}]  }
   0x1   :  { %9 = vsyncpa [#allocation5 + $0x1], 0  ;;  %s1702_s9 = smov 0   ;;  %s1704_s10 = smov 0  }
   0x2   :  { %s1706_s11 = smov 0   ;;  %s1708_s12 = smov 0  }
   0x3   :  { %s1710_s13 = smov 0   ;;  %s1712_s14 = smov 0  }
   0x4 LB: > { %s1294_s15 = sadd.s32 4294967295, %s1680_s14   ;;  %s1295_s16 = sadd.s32 4294967294, %s1680_s14   ;;  %s1680_s14 = sphi %s1712_s14, %s15_s14   ;;  %s1676_s13 = sphi %s1710_s13, %s2111_s13   ;;  %s1672_s12 = sphi %s1708_s12, %s2110_s12   ;;  %s1668_s11 = sphi %s1706_s11, %s2109_s11   ;;  %s1664_s10 = sphi %s1704_s10, %s2108_s10   ;;  %s1660_s9 = sphi %s1702_s9, %s2107_s9  }
   0x5   : > { %s27_s17 = sadd.s32 1, %s1676_s13  ;;  %s62_s18 = sadd.s32 1, %s1668_s11 }
   0x6   : > { %p29_p0 = scmp.ge.s32.totalorder %s27_s17, 2  ;;  %p72_p1 = scmp.ne.s32.totalorder %s1668_s11, %s1664_s10 }
   0x7   : > { %p73_p2 = scmp.eq.s32.totalorder %s1294_s15, 1  ;;  %p78_p3 = scmp.ne.s32.totalorder %s1664_s10, %s1660_s9 }
   0x8   : > { %s2113_s17 = smov (%p29_p0, %s27_s17), 0  ;;  %p79_p5 = scmp.eq.s32.totalorder %s1295_s16, 1 }
   0x9   : > { %p1742_p4 = por %p73_p2, %p72_p1  ;;  %s59_s20 = ssub.s32 %s1676_s13, %s2113_s17 }
   0xa   : > { %p1298_p6 = scmp.ge.s32.totalorder %s1680_s14, 1  ;;  %p60_p7 = scmp.eq.s32.totalorder %s59_s20, 0 }
   0xb   : > { %p1749_p8 = por %p79_p5, %p78_p3  ;;  %p108_p9 = scmp.lt.s32.totalorder %s1680_s14, 3 }
   0xc   : > { %s1755_s22 = scalar_select %p60_p7, %s1668_s11, %s62_s18  }
   0xd   : > { %p109_p10 = pnand %p1298_p6, %p108_p9 }
   0xe   : > { %s126_s23 = sand.u32 (!%p109_p10), 1, %s1664_s10   ;;  %s1300_s24 = sshll.u32 (!%p109_p10), %s1672_s12, 4 }
   0xf   : > { %112 = sbr.rel (%p109_p10) target bundleno = 845 (0x34d), region = 24  ;;  %s1764_s27 = sshll.u32 (!%p109_p10), %s126_s23, 3 }
  0x10   : > { %p131_p11 = scmp.lt.s32.totalorder (!%p109_p10), %s1300_s24, 31  ;;  %s128_s4 = scalar_lea.vmem (!%p109_p10), [#allocation4], %s1764_s27 }
  0x14   : > { %v174_v0 = vld [vmem:[%s2103_s1] sm:$0xff]  ;;  %s2115_s24 = smov (!%p131_p11, %s1300_s24), 31 }
  0x15   : > { %s1301_s28 = sshll.u32 %s2115_s24, 3 }
  0x16   : > { %s1769_s3 = scalar_lea.vmem %s2102_s0, %s1301_s28 }
  0x17   : > { %183 = vsyncadd [#allocation3], 128 }
  0x18   : > { %1652 = dma.done.wait [#allocation3], 128 }
  0x19   : > { %1653 = vsyncadd [#allocation3], 4294967168  ;;  %1452 = vmatprep.subr.mxu0 %v174_v0  ;;  %1526 = vmatprep.subr.mxu1 %v174_v0  ;;  %v1682_v1 = vmov 0   ;;  %v193_v2 = vld [vmem:[%s1769_s3 + $0x10] sm:$0xff]  ;;  %v191_v3 = vld [vmem:[%s1769_s3] sm:$0xff]  ;;  %v1683_v11 = vmov 1   ;;  %v189_v20 = vlaneseq }
  0x1a   : > { %1590 = vset.pattern.permute.xlu1 %v1682_v1  ;;  %1589 = vset.pattern.permute.xlu0 %v1682_v1  ;;  %v194_v4 = vld [vmem:[%s1769_s3 + $0x18] sm:$0xff]  ;;  %v192_v5 = vld [vmem:[%s1769_s3 + $0x8] sm:$0xff]  ;;  %v195_v7 = vld [vmem:[%s1769_s3 + $0x20] sm:$0xff]  ;;  %v1684_v19 = vmov 2   ;;  %vm495_vm0 = vcmask 64512   ;;  %v1685_v24 = vmov 0.0  }
  0x1b   : > { %1453 = vmatpush3.msra.mxu0 %v174_v0  ;;  %1527 = vmatpush3.msra.mxu1 %v174_v0  ;;  %v196_v6 = vld [vmem:[%s1769_s3 + $0x28] sm:$0xff]  ;;  %v198_v8 = vld [vmem:[%s1769_s3 + $0x38] sm:$0xff]  ;;  %v197_v9 = vld [vmem:[%s1769_s3 + $0x30] sm:$0xff]  ;;  %v1788_v21 = vand.u32 127, %v189_v20  ;;  %s1399_s5 = sshll.u32 %s1672_s12, 7  ;;  %s1213_s6 = sshll.u32 %s128_s4, 4  ;;  %s1214_s6 = int_to_ptr.vmem [resolvable:$true] %s1213_s6 }
  0x1c   : > { %214 = vperm.xlu1 %1590, %v193_v2   ;;  %208 = vperm.xlu0 %1589, %v191_v3   ;;  %v199_v10 = vld [vmem:[%s1769_s3 + $0x40] sm:$0xff]  ;;  %v200_v12 = vld [vmem:[%s1769_s3 + $0x48] sm:$0xff]  ;;  %v201_v13 = vld [vmem:[%s1769_s3 + $0x50] sm:$0xff]  ;;  %s1211_s16 = scalar_lea.hbm %s2104_s2, %s1399_s5  ;;  %s1200_s18 = scalar_lea.sflag [#allocation5], %s126_s23 }
  0x1d   : > { %v202_v14 = vld [vmem:[%s1769_s3 + $0x58] sm:$0xff]  ;;  %v203_v15 = vld [vmem:[%s1769_s3 + $0x60] sm:$0xff]  ;;  %v204_v16 = vld [vmem:[%s1769_s3 + $0x68] sm:$0xff]  ;;  %s1602_s20 = scalar_lea.vmem %s1214_s6, 128  ;;  %s1686_s24 = smov [#allocation4]  }
  0x1e   : > { %v205_v17 = vld [vmem:[%s1769_s3 + $0x70] sm:$0xff]  ;;  %v206_v18 = vld [vmem:[%s1769_s3 + $0x78] sm:$0xff]  ;;  %p1603_p12 = scmp.ne.s32.totalorder %s1214_s6, %s1602_s20  ;;  %s1606_s12 = sshll.u32 %s1686_s24, 4  ;;  %s1607_s12 = int_to_ptr.vmem [resolvable:$false] %s1606_s12 }
  0x1f   : > { %s1608_s25 = scalar_lea.vmem %s1607_s12, 256  ;;  %p1609_p1 = scmp.lt.s32.totalorder %s1214_s6, %s1607_s12 }
  0x20   : > { %217 = vperm.xlu1 %1590, %v194_v4   ;;  %211 = vperm.xlu0 %1589, %v192_v5   ;;  %p1604_p13 = pnand %p1603_p12, %p1742_p4  ;;  %p1610_p2 = scmp.lt.s32.totalorder %s1608_s25, %s1602_s20 }
  0x22   : > { %p1605_p0 = pneg %p1604_p13  ;;  %p1611_p3 = por %p1610_p2, %p1609_p1 }
  0x24   : > { %223 = vperm.xlu1 %1590, %v196_v6   ;;  %220 = vperm.xlu0 %1589, %v195_v7   ;;  %p1612_p5 = pnand %p1611_p3, %p1605_p0 }
  0x28   : > { %229 = vperm.xlu1 %1590, %v198_v8   ;;  %226 = vperm.xlu0 %1589, %v197_v9  }
  0x2c   : > { %1591 = vset.pattern.permute.xlu1 %v1683_v11  ;;  %232 = vperm.xlu0 %1589, %v199_v10  }
  0x2d   : > { %328 = vperm.xlu1 %1591, %v199_v10  }
  0x30   : > { %235 = vperm.xlu0 %1589, %v200_v12  }
  0x31   : > { %331 = vperm.xlu1 %1591, %v200_v12  }
  0x34   : > { %238 = vperm.xlu0 %1589, %v201_v13  }
  0x35   : > { %334 = vperm.xlu1 %1591, %v201_v13  }
  0x38   : > { %241 = vperm.xlu0 %1589, %v202_v14  }
  0x39   : > { %337 = vperm.xlu1 %1591, %v202_v14  }
  0x3c   : > { %244 = vperm.xlu0 %1589, %v203_v15  }
  0x3d   : > { %340 = vperm.xlu1 %1591, %v203_v15  }
  0x40   : > { %247 = vperm.xlu0 %1589, %v204_v16  }
  0x41   : > { %343 = vperm.xlu1 %1591, %v204_v16  }
  0x44   : > { %250 = vperm.xlu0 %1589, %v205_v17  }
  0x45   : > { %346 = vperm.xlu1 %1591, %v205_v17  }
  0x48   : > { %253 = vperm.xlu0 %1589, %v206_v18  }
  0x49   : > { %349 = vperm.xlu1 %1591, %v206_v18  }
  0x4c   : > { %1594 = vset.pattern.permute.xlu0 %v1684_v19 }
  0x4d   : > { %1592 = vset.pattern.permute.xlu1 %v1684_v19  ;;  %403 = vperm.xlu0 %1594, %v192_v5  }
  0x4e   : > { %400 = vperm.xlu1 %1592, %v191_v3  }
  0x51   : > { %412 = vperm.xlu0 %1594, %v195_v7  }
  0x52   : > { %1593 = vset.pattern.permute.xlu1 %v1683_v11 }
  0x53   : > { %307 = vperm.xlu1 %1593, %v192_v5  }
  0x55   : > { %1597 = vset.pattern.permute.xlu0 %v1683_v11 }
  0x56   : > { %304 = vperm.xlu0 %1597, %v191_v3  }
  0x57   : > { %310 = vperm.xlu1 %1593, %v193_v2  }
  0x5a   : > { %313 = vperm.xlu0 %1597, %v194_v4  }
  0x5b   : > { %1595 = vset.pattern.permute.xlu1 %v1684_v19 }
  0x5c   : > { %406 = vperm.xlu1 %1595, %v193_v2  }
  0x5e   : > { %322 = vperm.xlu0 %1597, %v197_v9  }
  0x60   : > { %409 = vperm.xlu1 %1595, %v194_v4  }
  0x62   : > { %1600 = vset.pattern.permute.xlu0 %v1684_v19 }
  0x63   : > { %421 = vperm.xlu0 %1600, %v198_v8  }
  0x64   : > { %1596 = vset.pattern.permute.xlu1 %v1683_v11 }
  0x65   : > { %316 = vperm.xlu1 %1596, %v195_v7  }
  0x67   : > { %430 = vperm.xlu0 %1600, %v201_v13  }
  0x69   : > { %319 = vperm.xlu1 %1596, %v196_v6  }
  0x6b   : > { %436 = vperm.xlu0 %1600, %v203_v15  }
  0x6d   : > { %1598 = vset.pattern.permute.xlu1 %v1684_v19 }
  0x6e   : > { %415 = vperm.xlu1 %1598, %v196_v6  }
  0x6f   : > { %442 = vperm.xlu0 %1600, %v205_v17  }
  0x72   : > { %418 = vperm.xlu1 %1598, %v197_v9  }
  0x76   : > { %1599 = vset.pattern.permute.xlu1 %v1683_v11 }
  0x77   : > { %325 = vperm.xlu1 %1599, %v198_v8  }
  0x7b   : > { %1601 = vset.pattern.permute.xlu1 %v1684_v19 }
  0x7c   : > { %424 = vperm.xlu1 %1601, %v199_v10  }
  0x80   : > { %427 = vperm.xlu1 %1601, %v200_v12  }
  0x84   : > { %433 = vperm.xlu1 %1601, %v202_v14  }
  0x88   : > { %439 = vperm.xlu1 %1601, %v204_v16  }
  0x8c   : > { %445 = vperm.xlu1 %1601, %v206_v18  }
  0x97   : > { %v215_v22 = vpop.permute.xlu1 %214  ;;  %v209_v23 = vpop.permute.xlu0 %208 }
  0x98   : > { %vm255_vm1 = vcmp.eq.s32.totalorder %v209_v23, %v1788_v21  ;;  %vm257_vm2 = vcmp.eq.s32.totalorder %v215_v22, %v1788_v21 }
  0x99   : > { %v1302_v25 = vsel %vm255_vm1, 1.0, %v1685_v24  ;;  %v1304_v29 = vsel %vm257_vm2, 1.0, %v1685_v24 }
  0x9a   : > { %1454 = vmatprep.mubr.msk.f32.mxu0 %vm495_vm0, %v1302_v25 }
  0x9b   : > { %v218_v26 = vpop.permute.xlu1 %217  ;;  %v212_v27 = vpop.permute.xlu0 %211 }
  0x9c   : > { %vm256_vm3 = vcmp.eq.s32.totalorder %v212_v27, %v1788_v21  ;;  %vm258_vm4 = vcmp.eq.s32.totalorder %v218_v26, %v1788_v21 }
  0x9d   : > { %v1303_v28 = vsel %vm256_vm3, 1.0, %v1685_v24  ;;  %v1305_v32 = vsel %vm258_vm4, 1.0, %v1685_v24 }
  0x9e   : > { %1455 = vmatmul.mubr.msk.f32.vlgmr.msra.gmra.mxu0 %vm495_vm0, %v1303_v28 }
  0x9f   : > { %v224_v30 = vpop.permute.xlu1 %223  ;;  %1457 = vmatprep.mubr.msk.f32.mxu0 %vm495_vm0, %v1304_v29  ;;  %v221_v31 = vpop.permute.xlu0 %220 }
  0xa0   : > { %vm259_vm5 = vcmp.eq.s32.totalorder %v221_v31, %v1788_v21  ;;  %vm260_vm6 = vcmp.eq.s32.totalorder %v224_v30, %v1788_v21 }
  0xa1   : > { %v1306_v33 = vsel %vm259_vm5, 1.0, %v1685_v24  ;;  %v1307_v36 = vsel %vm260_vm6, 1.0, %v1685_v24 }
  0xa2   : > { %1458 = vmatmul.mubr.msk.f32.gmra.mxu0 %vm495_vm0, %v1305_v32 }
  0xa3   : > { %v230_v34 = vpop.permute.xlu1 %229  ;;  %v227_v35 = vpop.permute.xlu0 %226  ;;  %1460 = vmatprep.mubr.msk.f32.mxu0 %vm495_vm0, %v1306_v33 }
  0xa4   : > { %vm261_vm7 = vcmp.eq.s32.totalorder %v227_v35, %v1788_v21  ;;  %vm262_vm8 = vcmp.eq.s32.totalorder %v230_v34, %v1788_v21 }
  0xa5   : > { %v1308_v37 = vsel %vm261_vm7, 1.0, %v1685_v24  ;;  %v1309_v40 = vsel %vm262_vm8, 1.0, %v1685_v24 }
  0xa6   : > { %1461 = vmatmul.mubr.msk.f32.gmra.mxu0 %vm495_vm0, %v1307_v36 }
  0xa7   : > { %v233_v38 = vpop.permute.xlu0 %232  ;;  %1463 = vmatprep.mubr.msk.f32.mxu0 %vm495_vm0, %v1308_v37 }
  0xa8   : > { %vm263_vm9 = vcmp.eq.s32.totalorder %v233_v38, %v1788_v21  ;;  %v329_v39 = vpop.permute.xlu1 %328 }
  0xa9   : > { %v1310_v41 = vsel %vm263_vm9, 1.0, %v1685_v24  ;;  %vm359_vm10 = vcmp.eq.s32.totalorder %v329_v39, %v1788_v21 }
  0xaa   : > { %1464 = vmatmul.mubr.msk.f32.gmra.mxu0 %vm495_vm0, %v1309_v40  ;;  %v1326_v42 = vsel %vm359_vm10, 1.0, %v1685_v24 }
  0xab   : > { %1490 = vmatprep.mubr.msk.f32.mxu1 %vm495_vm0, %v1326_v42  ;;  %v236_v43 = vpop.permute.xlu0 %235  ;;  %1466 = vmatprep.mubr.msk.f32.mxu0 %vm495_vm0, %v1310_v41 }
  0xac   : > { %vm264_vm11 = vcmp.eq.s32.totalorder %v236_v43, %v1788_v21  ;;  %v332_v44 = vpop.permute.xlu1 %331 }
  0xad   : > { %v1311_v45 = vsel %vm264_vm11, 1.0, %v1685_v24  ;;  %vm360_vm12 = vcmp.eq.s32.totalorder %v332_v44, %v1788_v21 }
  0xae   : > { %v1327_v46 = vsel %vm360_vm12, 1.0, %v1685_v24  ;;  %1467 = vmatmul.mubr.msk.f32.gmra.mxu0 %vm495_vm0, %v1311_v45 }
  0xaf   : > { %1491 = vmatmul.mubr.msk.f32.vlgmr.msra.gmra.mxu1 %vm495_vm0, %v1327_v46  ;;  %v239_v47 = vpop.permute.xlu0 %238 }
  0xb0   : > { %vm265_vm13 = vcmp.eq.s32.totalorder %v239_v47, %v1788_v21  ;;  %v335_v48 = vpop.permute.xlu1 %334 }
  0xb1   : > { %v1312_v49 = vsel %vm265_vm13, 1.0, %v1685_v24  ;;  %vm361_vm14 = vcmp.eq.s32.totalorder %v335_v48, %v1788_v21 }
  0xb2   : > { %v1328_v50 = vsel %vm361_vm14, 1.0, %v1685_v24  ;;  %1469 = vmatprep.mubr.msk.f32.mxu0 %vm495_vm0, %v1312_v49 }
  0xb3   : > { %1493 = vmatprep.mubr.msk.f32.mxu1 %vm495_vm0, %v1328_v50  ;;  %v242_v51 = vpop.permute.xlu0 %241 }
  0xb4   : > { %vm266_vm15 = vcmp.eq.s32.totalorder %v242_v51, %v1788_v21  ;;  %v338_v52 = vpop.permute.xlu1 %337 }
  0xb5   : > { %v1313_v53 = vsel %vm266_vm15, 1.0, %v1685_v24  ;;  %vm362_vm1 = vcmp.eq.s32.totalorder %v338_v52, %v1788_v21 }
  0xb6   : > { %v1329_v54 = vsel %vm362_vm1, 1.0, %v1685_v24  ;;  %1470 = vmatmul.mubr.msk.f32.gmra.mxu0 %vm495_vm0, %v1313_v53 }
  0xb7   : > { %1494 = vmatmul.mubr.msk.f32.gmra.mxu1 %vm495_vm0, %v1329_v54  ;;  %v245_v55 = vpop.permute.xlu0 %244 }
  0xb8   : > { %vm267_vm2 = vcmp.eq.s32.totalorder %v245_v55, %v1788_v21  ;;  %v341_v56 = vpop.permute.xlu1 %340 }
  0xb9   : > { %v1314_v57 = vsel %vm267_vm2, 1.0, %v1685_v24  ;;  %vm363_vm3 = vcmp.eq.s32.totalorder %v341_v56, %v1788_v21 }
  0xba   : > { %v1330_v58 = vsel %vm363_vm3, 1.0, %v1685_v24  ;;  %1472 = vmatprep.mubr.msk.f32.mxu0 %vm495_vm0, %v1314_v57 }
  0xbb   : > { %1496 = vmatprep.mubr.msk.f32.mxu1 %vm495_vm0, %v1330_v58  ;;  %v248_v59 = vpop.permute.xlu0 %247 }
  0xbc   : > { %vm268_vm4 = vcmp.eq.s32.totalorder %v248_v59, %v1788_v21  ;;  %v344_v60 = vpop.permute.xlu1 %343 }
  0xbd   : > { %v1315_v61 = vsel %vm268_vm4, 1.0, %v1685_v24  ;;  %vm364_vm5 = vcmp.eq.s32.totalorder %v344_v60, %v1788_v21 }
  0xbe   : > { %v1331_v62 = vsel %vm364_vm5, 1.0, %v1685_v24  ;;  %1473 = vmatmul.mubr.msk.f32.gmra.mxu0 %vm495_vm0, %v1315_v61 }
  0xbf   : > { %1497 = vmatmul.mubr.msk.f32.gmra.mxu1 %vm495_vm0, %v1331_v62  ;;  %v251_v63 = vpop.permute.xlu0 %250 }
  0xc0   : > { %vm269_vm6 = vcmp.eq.s32.totalorder %v251_v63, %v1788_v21  ;;  %v347_v0 = vpop.permute.xlu1 %346 }
  0xc1   : > { %v1316_v1 = vsel %vm269_vm6, 1.0, %v1685_v24  ;;  %vm365_vm7 = vcmp.eq.s32.totalorder %v347_v0, %v1788_v21 }
  0xc2   : > { %v1332_v2 = vsel %vm365_vm7, 1.0, %v1685_v24  ;;  %1475 = vmatprep.mubr.msk.f32.mxu0 %vm495_vm0, %v1316_v1 }
  0xc3   : > { %1499 = vmatprep.mubr.msk.f32.mxu1 %vm495_vm0, %v1332_v2  ;;  %v254_v3 = vpop.permute.xlu0 %253 }
  0xc4   : > { %vm270_vm8 = vcmp.eq.s32.totalorder %v254_v3, %v1788_v21  ;;  %v350_v4 = vpop.permute.xlu1 %349 }
  0xc5   : > { %v1317_v5 = vsel %vm270_vm8, 1.0, %v1685_v24  ;;  %vm366_vm9 = vcmp.eq.s32.totalorder %v350_v4, %v1788_v21 }
  0xc6   : > { %v1333_v6 = vsel %vm366_vm9, 1.0, %v1685_v24  ;;  %1476 = vmatmul.mubr.msk.f32.gmra.mxu0 %vm495_vm0, %v1317_v5 }
  0xc7   : > { %1500 = vmatmul.mubr.msk.f32.gmra.mxu1 %vm495_vm0, %v1333_v6 }
  0xc8   : > { %v404_v7 = vpop.permute.xlu0 %403 }
  0xc9   : > { %v401_v8 = vpop.permute.xlu1 %400  ;;  %vm448_vm10 = vcmp.eq.s32.totalorder %v404_v7, %v1788_v21 }
  0xca   : > { %vm447_vm11 = vcmp.eq.s32.totalorder %v401_v8, %v1788_v21  ;;  %v1335_v9 = vsel %vm448_vm10, 1.0, %v1685_v24 }
  0xcb   : > { %v1334_v10 = vsel %vm447_vm11, 1.0, %v1685_v24 }
  0xcc   : > { %1502 = vmatprep.mubr.msk.f32.mxu1 %vm495_vm0, %v1334_v10  ;;  %v413_v11 = vpop.permute.xlu0 %412 }
  0xcd   : > { %1503 = vmatmul.mubr.msk.f32.gmra.mxu1 %vm495_vm0, %v1335_v9  ;;  %vm451_vm2 = vcmp.eq.s32.totalorder %v413_v11, %v1788_v21 }
  0xce   : > { %v308_v12 = vpop.permute.xlu1 %307  ;;  %v1338_v25 = vsel %vm451_vm2, 1.0, %v1685_v24 }
  0xcf   : > { %vm352_vm12 = vcmp.eq.s32.totalorder %v308_v12, %v1788_v21 }
  0xd0   : > { %v1319_v16 = vsel %vm352_vm12, 1.0, %v1685_v24 }
  0xd1   : > { %v305_v13 = vpop.permute.xlu0 %304 }
  0xd2   : > { %vm351_vm13 = vcmp.eq.s32.totalorder %v305_v13, %v1788_v21  ;;  %v311_v14 = vpop.permute.xlu1 %310 }
  0xd3   : > { %v1318_v15 = vsel %vm351_vm13, 1.0, %v1685_v24  ;;  %vm353_vm14 = vcmp.eq.s32.totalorder %v311_v14, %v1788_v21 }
  0xd4   : > { %v1320_v17 = vsel %vm353_vm14, 1.0, %v1685_v24  ;;  %1478 = vmatprep.mubr.msk.f32.mxu0 %vm495_vm0, %v1318_v15 }
  0xd5   : > { %1479 = vmatmul.mubr.msk.f32.gmra.mxu0 %vm495_vm0, %v1319_v16  ;;  %v314_v18 = vpop.permute.xlu0 %313 }
  0xd6   : > { %1481 = vmatprep.mubr.msk.f32.mxu0 %vm495_vm0, %v1320_v17  ;;  %vm354_vm15 = vcmp.eq.s32.totalorder %v314_v18, %v1788_v21 }
  0xd7   : > { %v1321_v19 = vsel %vm354_vm15, 1.0, %v1685_v24  ;;  %v407_v20 = vpop.permute.xlu1 %406 }
  0xd8   : > { %vm449_vm1 = vcmp.eq.s32.totalorder %v407_v20, %v1788_v21 }
  0xd9   : > { %v1336_v22 = vsel %vm449_vm1, 1.0, %v1685_v24  ;;  %1482 = vmatmul.mubr.msk.f32.gmra.mxu0 %vm495_vm0, %v1321_v19  ;;  %v323_v28 = vpop.permute.xlu0 %322 }
  0xda   : > { %1505 = vmatprep.mubr.msk.f32.mxu1 %vm495_vm0, %v1336_v22  ;;  %vm357_vm5 = vcmp.eq.s32.totalorder %v323_v28, %v1788_v21 }
  0xdb   : > { %v410_v23 = vpop.permute.xlu1 %409  ;;  %v1324_v31 = vsel %vm357_vm5, 1.0, %v1685_v24 }
  0xdc   : > { %vm450_vm3 = vcmp.eq.s32.totalorder %v410_v23, %v1788_v21 }
  0xdd   : > { %v1337_v26 = vsel %vm450_vm3, 1.0, %v1685_v24 }
  0xde   : > { %1506 = vmatmul.mubr.msk.f32.gmra.mxu1 %vm495_vm0, %v1337_v26  ;;  %v422_v34 = vpop.permute.xlu0 %421 }
  0xdf   : > { %1508 = vmatprep.mubr.msk.f32.mxu1 %vm495_vm0, %v1338_v25  ;;  %vm454_vm8 = vcmp.eq.s32.totalorder %v422_v34, %v1788_v21 }
  0xe0   : > { %v317_v27 = vpop.permute.xlu1 %316  ;;  %v1341_v37 = vsel %vm454_vm8, 1.0, %v1685_v24 }
  0xe1   : > { %vm355_vm4 = vcmp.eq.s32.totalorder %v317_v27, %v1788_v21 }
  0xe2   : > { %v1322_v29 = vsel %vm355_vm4, 1.0, %v1685_v24  ;;  %v431_v40 = vpop.permute.xlu0 %430  ;;  %vm1155_vm4 = vcmask 7168  }
  0xe3   : > { %1484 = vmatprep.mubr.msk.f32.mxu0 %vm495_vm0, %v1322_v29  ;;  %vm457_vm12 = vcmp.eq.s32.totalorder %v431_v40, %v1788_v21 }
  0xe4   : > { %v320_v30 = vpop.permute.xlu1 %319  ;;  %v1344_v47 = vsel %vm457_vm12, 1.0, %v1685_v24 }
  0xe5   : > { %vm356_vm6 = vcmp.eq.s32.totalorder %v320_v30, %v1788_v21 }
  0xe6   : > { %v1323_v32 = vsel %vm356_vm6, 1.0, %v1685_v24  ;;  %v437_v44 = vpop.permute.xlu0 %436 }
  0xe7   : > { %1485 = vmatmul.mubr.msk.f32.gmra.mxu0 %vm495_vm0, %v1323_v32  ;;  %vm459_vm14 = vcmp.eq.s32.totalorder %v437_v44, %v1788_v21 }
  0xe8   : > { %1487 = vmatprep.mubr.msk.f32.mxu0 %vm495_vm0, %v1324_v31  ;;  %v1346_v51 = vsel %vm459_vm14, 1.0, %v1685_v24 }
  0xe9   : > { %v416_v33 = vpop.permute.xlu1 %415 }
  0xea   : > { %vm452_vm7 = vcmp.eq.s32.totalorder %v416_v33, %v1788_v21  ;;  %v443_v49 = vpop.permute.xlu0 %442 }
  0xeb   : > { %v1339_v35 = vsel %vm452_vm7, 1.0, %v1685_v24  ;;  %vm461_vm1 = vcmp.eq.s32.totalorder %v443_v49, %v1788_v21 }
  0xec   : > { %1509 = vmatmul.mubr.msk.f32.gmra.mxu1 %vm495_vm0, %v1339_v35  ;;  %v1348_v54 = vsel %vm461_vm1, 1.0, %v1685_v24 }
  0xed   : > { %v419_v36 = vpop.permute.xlu1 %418 }
  0xee   : > { %vm453_vm9 = vcmp.eq.s32.totalorder %v419_v36, %v1788_v21 }
  0xef   : > { %v1340_v38 = vsel %vm453_vm9, 1.0, %v1685_v24 }
  0xf0   : > { %1511 = vmatprep.mubr.msk.f32.mxu1 %vm495_vm0, %v1340_v38 }
  0xf1   : > { %1512 = vmatmul.mubr.msk.f32.gmra.mxu1 %vm495_vm0, %v1341_v37 }
  0xf2   : > { %v326_v39 = vpop.permute.xlu1 %325 }
  0xf3   : > { %vm358_vm10 = vcmp.eq.s32.totalorder %v326_v39, %v1788_v21 }
  0xf4   : > { %v1325_v41 = vsel %vm358_vm10, 1.0, %v1685_v24 }
  0xf5   : > { %1488 = vmatmul.mubr.msk.f32.gmra.mxu0 %vm495_vm0, %v1325_v41 }
  0xf7   : > { %v425_v42 = vpop.permute.xlu1 %424 }
  0xf8   : > { %vm455_vm11 = vcmp.eq.s32.totalorder %v425_v42, %v1788_v21 }
  0xf9   : > { %v1342_v43 = vsel %vm455_vm11, 1.0, %v1685_v24 }
  0xfa   : > { %1514 = vmatprep.mubr.msk.f32.mxu1 %vm495_vm0, %v1342_v43 }
  0xfb   : > { %v428_v45 = vpop.permute.xlu1 %427 }
  0xfc   : > { %vm456_vm13 = vcmp.eq.s32.totalorder %v428_v45, %v1788_v21 }
  0xfd   : > { %v1343_v46 = vsel %vm456_vm13, 1.0, %v1685_v24 }
  0xfe   : > { %1515 = vmatmul.mubr.msk.f32.gmra.mxu1 %vm495_vm0, %v1343_v46 }
  0xff   : > { %v434_v48 = vpop.permute.xlu1 %433  ;;  %1517 = vmatprep.mubr.msk.f32.mxu1 %vm495_vm0, %v1344_v47 }
 0x100   : > { %vm458_vm15 = vcmp.eq.s32.totalorder %v434_v48, %v1788_v21 }
 0x101   : > { %v1345_v50 = vsel %vm458_vm15, 1.0, %v1685_v24 }
 0x102   : > { %1518 = vmatmul.mubr.msk.f32.gmra.mxu1 %vm495_vm0, %v1345_v50 }
 0x103   : > { %v440_v52 = vpop.permute.xlu1 %439  ;;  %1520 = vmatprep.mubr.msk.f32.mxu1 %vm495_vm0, %v1346_v51 }
 0x104   : > { %vm460_vm2 = vcmp.eq.s32.totalorder %v440_v52, %v1788_v21 }
 0x105   : > { %v1347_v53 = vsel %vm460_vm2, 1.0, %v1685_v24 }
 0x106   : > { %1521 = vmatmul.mubr.msk.f32.gmra.mxu1 %vm495_vm0, %v1347_v53 }
 0x107   : > { %v446_v55 = vpop.permute.xlu1 %445  ;;  %1523 = vmatprep.mubr.msk.f32.mxu1 %vm495_vm0, %v1348_v54 }
 0x108   : > { %vm462_vm3 = vcmp.eq.s32.totalorder %v446_v55, %v1788_v21 }
 0x109   : > { %v1349_v56 = vsel %vm462_vm3, 1.0, %v1685_v24 }
 0x10a   : > { %1524 = vmatmul.mubr.msk.f32.gmra.mxu1 %vm495_vm0, %v1349_v56  ;;  %vm977_vm0 = vcmask 261120  }
 0x15e   : > { %v1456_v57 = vpop.f32.mrf.mxu0 }
 0x160   : > { %v1934_v58 = vpop.f32.mrf.mxu0 }
 0x162   : > { %v1459_v59 = vpop.f32.mrf.mxu0 }
 0x164   : > { %v716_v60 = vpop.f32.mrf.mxu0 }
 0x166   : > { %v1936_v61 = vpop.f32.mrf.mxu0 }
 0x168   : > { %v1938_v62 = vpop.f32.mrf.mxu0 }
 0x16a   : > { %v1940_v63 = vpop.f32.mrf.mxu0 }
 0x16c   : > { %v1942_v0 = vpop.f32.mrf.mxu0 }
 0x16e   : > { %v1944_v1 = vpop.f32.mrf.mxu0 }
 0x16f   : > { %v1492_v21 = vpop.f32.mrf.mxu1 }
 0x170   : > { %v954_v24 = vsub.f32 %v1944_v1, %v1492_v21  ;;  %v1947_v2 = vpop.f32.mrf.mxu0 }
 0x171   : > { %v826_v3 = vpop.f32.mrf.mxu1 }
 0x172   : > { %v970_v4 = vmul.f32 %v954_v24, %v954_v24  ;;  %v953_v5 = vsub.f32 %v1947_v2, %v826_v3 }
 0x174   : > { %v969_v6 = vmul.f32 %v953_v5, %v953_v5  ;;  %v1005_v7 = vsel %vm977_vm0, %v970_v4, 0.0 }
 0x175   : > { %1006 = vadd.xlane.f32.xlu1 %v1005_v7 }
 0x176   : > { %v1951_v8 = vpop.f32.mrf.mxu0  ;;  %v1002_v11 = vsel %vm977_vm0, %v969_v6, 0.0 }
 0x177   : > { %v1953_v9 = vpop.f32.mrf.mxu1 }
 0x178   : > { %v1955_v10 = vpop.f32.mrf.mxu0 }
 0x179   : > { %v836_v12 = vpop.f32.mrf.mxu1  ;;  %1003 = vadd.xlane.f32.xlu1 %v1002_v11 }
 0x17a   : > { %v955_v13 = vsub.f32 %v1955_v10, %v836_v12 }
 0x17c   : > { %v971_v14 = vmul.f32 %v955_v13, %v955_v13 }
 0x17e   : > { %v1008_v15 = vsel %vm977_vm0, %v971_v14, 0.0  ;;  %v1966_v19 = vpop.f32.mrf.mxu0 }
 0x17f   : > { %1009 = vadd.xlane.f32.xlu1 %v1008_v15  ;;  %v1960_v16 = vpop.f32.mrf.mxu1 }
 0x180   : > { %v1970_v22 = vpop.f32.mrf.mxu0 }
 0x181   : > { %v1962_v17 = vpop.f32.mrf.mxu1 }
 0x186   : > { %v1972_v26 = vpop.f32.mrf.mxu0 }
 0x187   : > { %v1964_v18 = vpop.f32.mrf.mxu1 }
 0x188   : > { %v1976_v32 = vpop.f32.mrf.mxu0 }
 0x189   : > { %v1968_v20 = vpop.f32.mrf.mxu1 }
 0x18d   : > { %v1504_v23 = vpop.f32.mrf.mxu1 }
 0x18e   : > { %v1027_v25 = vsub.f32 %v1456_v57, %v1504_v23 }
 0x18f   : > { %v866_v27 = vpop.f32.mrf.mxu1 }
 0x190   : > { %v1043_v28 = vmul.f32 %v1027_v25, %v1027_v25  ;;  %v1026_v29 = vsub.f32 %v1934_v58, %v866_v27 }
 0x192   : > { %v1042_v30 = vmul.f32 %v1026_v29, %v1026_v29  ;;  %v1061_v31 = vsel %vm977_vm0, %v1043_v28, 0.0 }
 0x193   : > { %1062 = vadd.xlane.f32.xlu0 %v1061_v31 }
 0x194   : > { %v1058_v35 = vsel %vm977_vm0, %v1042_v30, 0.0 }
 0x195   : > { %v1480_v33 = vpop.f32.mrf.mxu0 }
 0x196   : > { %v946_v34 = vsub.f32 %v1456_v57, %v1480_v33 }
 0x197   : > { %1059 = vadd.xlane.f32.xlu0 %v1058_v35  ;;  %v1979_v36 = vpop.f32.mrf.mxu0  ;;  %v956_v35 = vsub.f32 %v1951_v8, %v1953_v9 }
 0x198   : > { %v962_v37 = vmul.f32 %v946_v34, %v946_v34 }
 0x199   : > { %v1483_v38 = vpop.f32.mrf.mxu0 }
 0x19a   : > { %v948_v39 = vsub.f32 %v1459_v59, %v1483_v38  ;;  %v981_v40 = vsel %vm977_vm0, %v962_v37, 0.0 }
 0x19b   : > { %982 = vadd.xlane.f32.xlu1 %v981_v40  ;;  %v796_v41 = vpop.f32.mrf.mxu0  ;;  %v972_v40 = vmul.f32 %v956_v35, %v956_v35 }
 0x19c   : > { %v964_v42 = vmul.f32 %v948_v39, %v948_v39  ;;  %v947_v43 = vsub.f32 %v716_v60, %v796_v41 }
 0x19e   : > { %v963_v44 = vmul.f32 %v947_v43, %v947_v43  ;;  %v1507_v45 = vpop.f32.mrf.mxu1  ;;  %v987_v46 = vsel %vm977_vm0, %v964_v42, 0.0  ;;  %v945_v42 = vsub.f32 %v1934_v58, %v1979_v36 }
 0x19f   : > { %v1029_v47 = vsub.f32 %v1459_v59, %v1507_v45  ;;  %988 = vadd.xlane.f32.xlu1 %v987_v46  ;;  %v958_v45 = vsub.f32 %v1966_v19, %v1960_v16 }
 0x1a0   : > { %v876_v48 = vpop.f32.mrf.mxu1  ;;  %v984_v51 = vsel %vm977_vm0, %v963_v44, 0.0 }
 0x1a1   : > { %v1045_v49 = vmul.f32 %v1029_v47, %v1029_v47  ;;  %v1028_v50 = vsub.f32 %v716_v60, %v876_v48  ;;  %v1011_v48 = vsel %vm977_vm0, %v972_v40, 0.0  ;;  %v974_v36 = vmul.f32 %v958_v45, %v958_v45 }
 0x1a3   : > { %v1044_v52 = vmul.f32 %v1028_v50, %v1028_v50  ;;  %985 = vadd.xlane.f32.xlu1 %v984_v51  ;;  %v1067_v53 = vsel %vm977_vm0, %v1045_v49, 0.0 }
 0x1a4   : > { %1068 = vadd.xlane.f32.xlu0 %v1067_v53 }
 0x1a5   : > { %v1064_v55 = vsel %vm977_vm0, %v1044_v52, 0.0 }
 0x1a7   : > { %v1486_v54 = vpop.f32.mrf.mxu0 }
 0x1a8   : > { %v950_v56 = vsub.f32 %v1936_v61, %v1486_v54  ;;  %1065 = vadd.xlane.f32.xlu0 %v1064_v55 }
 0x1a9   : > { %v806_v57 = vpop.f32.mrf.mxu0 }
 0x1aa   : > { %v966_v21 = vmul.f32 %v950_v56, %v950_v56  ;;  %v949_v59 = vsub.f32 %v1938_v62, %v806_v57  ;;  %v1017_v56 = vsel %vm977_vm0, %v974_v36, 0.0 }
 0x1ac   : > { %v965_v24 = vmul.f32 %v949_v59, %v949_v59  ;;  %v1510_v3 = vpop.f32.mrf.mxu1  ;;  %v993_v60 = vsel %vm977_vm0, %v966_v21, 0.0 }
 0x1ad   : > { %v1031_v4 = vsub.f32 %v1936_v61, %v1510_v3  ;;  %994 = vadd.xlane.f32.xlu1 %v993_v60 }
 0x1ae   : > { %v886_v5 = vpop.f32.mrf.mxu1  ;;  %v990_v11 = vsel %vm977_vm0, %v965_v24, 0.0 }
 0x1af   : > { %v1047_v6 = vmul.f32 %v1031_v4, %v1031_v4  ;;  %v1030_v7 = vsub.f32 %v1938_v62, %v886_v5 }
 0x1b1   : > { %v1046_v12 = vmul.f32 %v1030_v7, %v1030_v7  ;;  %991 = vadd.xlane.f32.xlu1 %v990_v11  ;;  %v1513_v13 = vpop.f32.mrf.mxu1  ;;  %v1073_v14 = vsel %vm977_vm0, %v1047_v6, 0.0 }
 0x1b2   : > { %v1033_v15 = vsub.f32 %v1940_v63, %v1513_v13  ;;  %1074 = vadd.xlane.f32.xlu0 %v1073_v14 }
 0x1b3   : > { %v896_v23 = vpop.f32.mrf.mxu1  ;;  %v1070_v28 = vsel %vm977_vm0, %v1046_v12, 0.0 }
 0x1b4   : > { %v1049_v25 = vmul.f32 %v1033_v15, %v1033_v15  ;;  %v1032_v27 = vsub.f32 %v1942_v0, %v896_v23 }
 0x1b5   : > { %v1489_v61 = vpop.f32.mrf.mxu0 }
 0x1b6   : > { %v952_v29 = vsub.f32 %v1940_v63, %v1489_v61  ;;  %1071 = vadd.xlane.f32.xlu0 %v1070_v28  ;;  %v1048_v33 = vmul.f32 %v1032_v27, %v1032_v27  ;;  %v1079_v34 = vsel %vm977_vm0, %v1049_v25, 0.0  ;;  %v957_v63 = vsub.f32 %v1970_v22, %v1962_v17 }
 0x1b7   : > { %v816_v62 = vpop.f32.mrf.mxu0  ;;  %v961_v17 = vmul.f32 %v945_v42, %v945_v42 }
 0x1b8   : > { %v968_v30 = vmul.f32 %v952_v29, %v952_v29  ;;  %v951_v31 = vsub.f32 %v1942_v0, %v816_v62  ;;  %v1076_v39 = vsel %vm977_vm0, %v1048_v33, 0.0  ;;  %v973_v46 = vmul.f32 %v957_v63, %v957_v63 }
 0x1b9   : > { %v978_v53 = vsel %vm977_vm0, %v961_v17, 0.0 }
 0x1ba   : > { %v967_v37 = vmul.f32 %v951_v31, %v951_v31  ;;  %1080 = vadd.xlane.f32.xlu0 %v1079_v34  ;;  %v999_v38 = vsel %vm977_vm0, %v968_v30, 0.0  ;;  %v1014_v51 = vsel %vm977_vm0, %v973_v46, 0.0 }
 0x1bb   : > { %1000 = vadd.xlane.f32.xlu1 %v999_v38 }
 0x1bc   : > { %v996_v0 = vsel %vm977_vm0, %v967_v37, 0.0 }
 0x1be   : > { %1077 = vadd.xlane.f32.xlu0 %v1076_v39  ;;  %v1516_v41 = vpop.f32.mrf.mxu1 }
 0x1bf   : > { %v1035_v9 = vsub.f32 %v1944_v1, %v1516_v41  ;;  %997 = vadd.xlane.f32.xlu1 %v996_v0  ;;  %v959_v1 = vsub.f32 %v1976_v32, %v1968_v20 }
 0x1c0   : > { %v906_v43 = vpop.f32.mrf.mxu1 }
 0x1c1   : > { %v1051_v44 = vmul.f32 %v1035_v9, %v1035_v9  ;;  %v1034_v49 = vsub.f32 %v1947_v2, %v906_v43  ;;  %v960_v2 = vsub.f32 %v1972_v26, %v1964_v18  ;;  %v975_v55 = vmul.f32 %v959_v1, %v959_v1 }
 0x1c2   : > { %v1519_v47 = vpop.f32.mrf.mxu1 }
 0x1c3   : > { %1012 = vadd.xlane.f32.xlu1 %v1011_v48  ;;  %v1085_v50 = vsel %vm977_vm0, %v1051_v44, 0.0  ;;  %v1050_v52 = vmul.f32 %v1034_v49, %v1034_v49  ;;  %v1037_v57 = vsub.f32 %v1951_v8, %v1519_v47  ;;  %v1020_v24 = vsel %vm977_vm0, %v975_v55, 0.0 }
 0x1c4   : > { %1086 = vadd.xlane.f32.xlu0 %v1085_v50  ;;  %v916_v58 = vpop.f32.mrf.mxu1 }
 0x1c5   : > { %v1036_v16 = vsub.f32 %v1955_v10, %v916_v58  ;;  %v1082_v20 = vsel %vm977_vm0, %v1050_v52, 0.0  ;;  %v976_v10 = vmul.f32 %v960_v2, %v960_v2  ;;  %v1053_v3 = vmul.f32 %v1037_v57, %v1037_v57 }
 0x1c6   : > { %v1522_v54 = vpop.f32.mrf.mxu1 }
 0x1c7   : > { %1015 = vadd.xlane.f32.xlu1 %v1014_v51  ;;  %v1052_v21 = vmul.f32 %v1036_v16, %v1036_v16  ;;  %v1023_v5 = vsel %vm977_vm0, %v976_v10, 0.0  ;;  %v1039_v8 = vsub.f32 %v1966_v19, %v1522_v54  ;;  %v1091_v7 = vsel %vm977_vm0, %v1053_v3, 0.0 }
 0x1c8   : > { %979 = vadd.xlane.f32.xlu0 %v978_v53  ;;  %v926_v59 = vpop.f32.mrf.mxu1 }
 0x1c9   : > { %v1038_v60 = vsub.f32 %v1970_v22, %v926_v59  ;;  %v1088_v18 = vsel %vm977_vm0, %v1052_v21, 0.0  ;;  %v1055_v12 = vmul.f32 %v1039_v8, %v1039_v8 }
 0x1ca   : > { %v1525_v4 = vpop.f32.mrf.mxu1 }
 0x1cb   : > { %1018 = vadd.xlane.f32.xlu1 %v1017_v56  ;;  %v1054_v6 = vmul.f32 %v1038_v60, %v1038_v60  ;;  %v1041_v14 = vsub.f32 %v1972_v26, %v1525_v4  ;;  %v1097_v23 = vsel %vm977_vm0, %v1055_v12, 0.0 }
 0x1cc   : > { %1083 = vadd.xlane.f32.xlu0 %v1082_v20  ;;  %v936_v11 = vpop.f32.mrf.mxu1 }
 0x1cd   : > { %v1040_v13 = vsub.f32 %v1976_v32, %v936_v11  ;;  %v1094_v22 = vsel %vm977_vm0, %v1054_v6, 0.0  ;;  %v1057_v25 = vmul.f32 %v1041_v14, %v1041_v14 }
 0x1cf   : > { %1021 = vadd.xlane.f32.xlu1 %v1020_v24  ;;  %v1056_v15 = vmul.f32 %v1040_v13, %v1040_v13  ;;  %v1103_v27 = vsel %vm977_vm0, %v1057_v25, 0.0 }
 0x1d0   : > { %1089 = vadd.xlane.f32.xlu0 %v1088_v18 }
 0x1d1   : > { %v1100_v19 = vsel %vm977_vm0, %v1056_v15, 0.0 }
 0x1d3   : > { %1024 = vadd.xlane.f32.xlu1 %v1023_v5 }
 0x1d4   : > { %1092 = vadd.xlane.f32.xlu0 %v1091_v7 }
 0x1d8   : > { %1095 = vadd.xlane.f32.xlu0 %v1094_v22 }
 0x1dc   : > { %1098 = vadd.xlane.f32.xlu0 %v1097_v23 }
 0x1e0   : > { %1101 = vadd.xlane.f32.xlu0 %v1100_v19 }
 0x1e4   : > { %1104 = vadd.xlane.f32.xlu0 %v1103_v27 }
 0x1fe   : > { %v2036_v61 = vpop.xlane.xlu1 %1006 }
 0x202   : > { %v1004_v28 = vpop.xlane.xlu1 %1003 }
 0x208   : > { %v2038_v29 = vpop.xlane.xlu1 %1009 }
 0x21c   : > { %v1063_v32 = vpop.xlane.xlu0 %1062 }
 0x220   : > { %v1060_v62 = vpop.xlane.xlu0 %1059 }
 0x224   : > { %v983_v30 = vpop.xlane.xlu1 %982 }
 0x225   : > { %v1107_v0 = vsub.f32 %v983_v30, %v1063_v32 }
 0x227   : > { %v1123_v43 = vadd.f32 1.0, %v1107_v0 }
 0x228   : > { %v989_v31 = vpop.xlane.xlu1 %988 }
 0x229   : > { %v1139_v49 = vmax.f32 %v1123_v43, 0.0 }
 0x22b   : > { %v1157_v2 = vsel %vm1155_vm4, %v1139_v49, 0.0 }
 0x22c   : > { %v986_v34 = vpop.xlane.xlu1 %985 }
 0x22d   : > { %v1069_v26 = vpop.xlane.xlu0 %1068 }
 0x22e   : > { %v1109_v45 = vsub.f32 %v989_v31, %v1069_v26 }
 0x230   : > { %v1125_v50 = vadd.f32 1.0, %v1109_v45 }
 0x231   : > { %v1066_v33 = vpop.xlane.xlu0 %1065 }
 0x232   : > { %v1108_v9 = vsub.f32 %v986_v34, %v1066_v33  ;;  %v1141_v55 = vmax.f32 %v1125_v50, 0.0 }
 0x234   : > { %v1124_v47 = vadd.f32 1.0, %v1108_v9  ;;  %v1161_v5 = vsel %vm1155_vm4, %v1141_v55, 0.0 }
 0x236   : > { %v995_v37 = vpop.xlane.xlu1 %994  ;;  %v1140_v52 = vmax.f32 %v1124_v47, 0.0 }
 0x238   : > { %v1159_v10 = vsel %vm1155_vm4, %v1140_v52, 0.0 }
 0x23a   : > { %v992_v40 = vpop.xlane.xlu1 %991 }
 0x23b   : > { %v1075_v35 = vpop.xlane.xlu0 %1074 }
 0x23c   : > { %v1111_v58 = vsub.f32 %v995_v37, %v1075_v35 }
 0x23e   : > { %v1127_v56 = vadd.f32 1.0, %v1111_v58 }
 0x23f   : > { %v1072_v38 = vpop.xlane.xlu0 %1071 }
 0x240   : > { %v1110_v48 = vsub.f32 %v992_v40, %v1072_v38  ;;  %v1143_v8 = vmax.f32 %v1127_v56, 0.0 }
 0x242   : > { %v1126_v16 = vadd.f32 1.0, %v1110_v48  ;;  %v1165_v25 = vsel %vm1155_vm4, %v1143_v8, 0.0 }
 0x243   : > { %v1081_v39 = vpop.xlane.xlu0 %1080 }
 0x244   : > { %v1001_v63 = vpop.xlane.xlu1 %1000  ;;  %v1142_v24 = vmax.f32 %v1126_v16, 0.0 }
 0x245   : > { %v1113_v57 = vsub.f32 %v1001_v63, %v1081_v39 }
 0x246   : > { %v1163_v13 = vsel %vm1155_vm4, %v1142_v24, 0.0 }
 0x247   : > { %v1078_v41 = vpop.xlane.xlu0 %1077  ;;  %v1129_v6 = vadd.f32 1.0, %v1113_v57 }
 0x248   : > { %v998_v44 = vpop.xlane.xlu1 %997 }
 0x249   : > { %v1112_v53 = vsub.f32 %v998_v44, %v1078_v41  ;;  %v1145_v19 = vmax.f32 %v1129_v6, 0.0 }
 0x24b   : > { %v1128_v3 = vadd.f32 1.0, %v1112_v53  ;;  %v1169_v35 = vsel %vm1155_vm4, %v1145_v19, 0.0 }
 0x24c   : > { %v1013_v1 = vpop.xlane.xlu1 %1012 }
 0x24d   : > { %v1087_v42 = vpop.xlane.xlu0 %1086  ;;  %v1144_v22 = vmax.f32 %v1128_v3, 0.0 }
 0x24e   : > { %v1115_v7 = vsub.f32 %v2036_v61, %v1087_v42 }
 0x24f   : > { %v1167_v26 = vsel %vm1155_vm4, %v1144_v22, 0.0 }
 0x250   : > { %v1016_v18 = vpop.xlane.xlu1 %1015  ;;  %v1131_v27 = vadd.f32 1.0, %v1115_v7 }
 0x251   : > { %v980_v46 = vpop.xlane.xlu0 %979 }
 0x252   : > { %v1106_v17 = vsub.f32 %v980_v46, %v1060_v62  ;;  %v1147_v37 = vmax.f32 %v1131_v27, 0.0 }
 0x254   : > { %v1122_v36 = vadd.f32 1.0, %v1106_v17  ;;  %v1019_v32 = vpop.xlane.xlu1 %1018  ;;  %v1173_v43 = vsel %vm1155_vm4, %v1147_v37, 0.0 }
 0x255   : > { %v1084_v51 = vpop.xlane.xlu0 %1083 }
 0x256   : > { %v1138_v54 = vmax.f32 %v1122_v36, 0.0  ;;  %v1114_v60 = vsub.f32 %v1004_v28, %v1084_v51 }
 0x258   : > { %v1156_v21 = vsel %vm1155_vm4, %v1138_v54, 0.0  ;;  %v1130_v14 = vadd.f32 1.0, %v1114_v60  ;;  %v1022_v9 = vpop.xlane.xlu1 %1021 }
 0x259   : > { %v1158_v20 = vadd.f32 %v1157_v2, %v1156_v21  ;;  %v1090_v59 = vpop.xlane.xlu0 %1089 }
 0x25a   : > { %v1116_v15 = vsub.f32 %v2038_v29, %v1090_v59  ;;  %v1146_v61 = vmax.f32 %v1130_v14, 0.0 }
 0x25b   : > { %v1160_v4 = vadd.f32 %v1159_v10, %v1158_v20 }
 0x25c   : > { %v1132_v31 = vadd.f32 1.0, %v1116_v15  ;;  %v1171_v40 = vsel %vm1155_vm4, %v1146_v61, 0.0  ;;  %v1025_v51 = vpop.xlane.xlu1 %1024 }
 0x25d   : > { %v1162_v11 = vadd.f32 %v1161_v5, %v1160_v4  ;;  %v1093_v12 = vpop.xlane.xlu0 %1092 }
 0x25e   : > { %v1117_v28 = vsub.f32 %v1013_v1, %v1093_v12  ;;  %v1148_v63 = vmax.f32 %v1132_v31, 0.0 }
 0x25f   : > { %v1164_v23 = vadd.f32 %v1163_v13, %v1162_v11 }
 0x260   : > { %v1133_v38 = vadd.f32 1.0, %v1117_v28  ;;  %v1175_v48 = vsel %vm1155_vm4, %v1148_v63, 0.0 }
 0x261   : > { %v1166_v62 = vadd.f32 %v1165_v25, %v1164_v23  ;;  %v1096_v30 = vpop.xlane.xlu0 %1095 }
 0x262   : > { %v1118_v33 = vsub.f32 %v1016_v18, %v1096_v30  ;;  %v1149_v44 = vmax.f32 %v1133_v38, 0.0 }
 0x263   : > { %v1168_v34 = vadd.f32 %v1167_v26, %v1166_v62 }
 0x264   : > { %v1134_v41 = vadd.f32 1.0, %v1118_v33  ;;  %v1177_v58 = vsel %vm1155_vm4, %v1149_v44, 0.0 }
 0x265   : > { %v1170_v29 = vadd.f32 %v1169_v35, %v1168_v34  ;;  %v1099_v39 = vpop.xlane.xlu0 %1098 }
 0x266   : > { %v1119_v0 = vsub.f32 %v1019_v32, %v1099_v39  ;;  %v1150_v17 = vmax.f32 %v1134_v41, 0.0 }
 0x267   : > { %v1172_v42 = vadd.f32 %v1171_v40, %v1170_v29 }
 0x268   : > { %v1135_v45 = vadd.f32 1.0, %v1119_v0  ;;  %v1179_v53 = vsel %vm1155_vm4, %v1150_v17, 0.0 }
 0x269   : > { %v1174_v46 = vadd.f32 %v1173_v43, %v1172_v42  ;;  %v1102_v47 = vpop.xlane.xlu0 %1101 }
 0x26a   : > { %v1120_v49 = vsub.f32 %v1022_v9, %v1102_v47  ;;  %v1151_v36 = vmax.f32 %v1135_v45, 0.0 }
 0x26b   : > { %v1176_v50 = vadd.f32 %v1175_v48, %v1174_v46 }
 0x26c   : > { %v1136_v1 = vadd.f32 1.0, %v1120_v49  ;;  %v1181_v56 = vsel %vm1155_vm4, %v1151_v36, 0.0 }
 0x26d   : > { %v1178_v52 = vadd.f32 %v1177_v58, %v1176_v50  ;;  %v1105_v16 = vpop.xlane.xlu0 %1104 }
 0x26e   : > { %v1152_v54 = vmax.f32 %v1136_v1, 0.0  ;;  %v1121_v2 = vsub.f32 %v1025_v51, %v1105_v16 }
 0x26f   : > { %v1180_v55 = vadd.f32 %v1179_v53, %v1178_v52 }
 0x270   : > { %v1137_v57 = vadd.f32 1.0, %v1121_v2  ;;  %v1183_v20 = vsel %vm1155_vm4, %v1152_v54, 0.0 }
 0x271   : > { %v1182_v21 = vadd.f32 %v1181_v56, %v1180_v55 }
 0x272   : > { %v1153_v59 = vmax.f32 %v1137_v57, 0.0 }
 0x273   : > { %v1184_v10 = vadd.f32 %v1183_v20, %v1182_v21 }
 0x274   : > { %v1185_v24 = vsel %vm1155_vm4, %v1153_v59, 0.0 }
 0x275   : > { %v1186_v3 = vadd.f32 %v1185_v24, %v1184_v10 }
 0x277   : > { %1187 = vadd.xlane.f32.xlu1 %v1186_v3 }
 0x300   : > { %v1188_v60 = vpop.xlane.xlu1 %1187 }
 0x301   : > { %v1189_v18 = vrot.slane %v1188_v60, 4 }
 0x303   : > { %v1190_v4 = vadd.f32 %v1189_v18, %v1188_v60 }
 0x305   : > { %v1191_v5 = vrot.slane %v1190_v4, 2 }
 0x307   : > { %v1192_v8 = vadd.f32 %v1191_v5, %v1190_v4 }
 0x309   : > { %v1193_v6 = vrot.slane %v1192_v8, 1 }
 0x30b   : > { %v1194_v7 = vadd.f32 %v1193_v6, %v1192_v8 }
 0x30d   : > { %1528 = vpush %v1194_v7 }
 0x33e   : > { %s1529_s7 = spop %1528 }
 0x33f   : > { %v1196_v11 = vstv %s1529_s7 }
 0x340   : > { %1198 = vst [vmem:[%s128_s4] sm:$0xff] %v1196_v11 }
 0x341   : > { %1615 = shalt.err (!%p1612_p5)
}
 0x342   : > { %s1616_s26 = scalar_lea.hbm %s1211_s16, 128  ;;  %s1620_s28 = scalar_lea.hbm %s2104_s2, 256 }
 0x343   : > { %p1617_p6 = scmp.ne.s32.totalorder %s1211_s16, %s1616_s26  ;;  %p1621_p10 = scmp.lt.s32.totalorder %s1211_s16, %s2104_s2 }
 0x344   : > { %p1622_p11 = scmp.lt.s32.totalorder %s1620_s28, %s1616_s26 }
 0x345   : > { %p1618_p7 = pnand %p1617_p6, %p1742_p4 }
 0x346   : > { %p1623_p12 = por %p1622_p11, %p1621_p10 }
 0x347   : > { %p1619_p9 = pneg %p1618_p7 }
 0x349   : > { %p1624_p13 = pnand %p1623_p12, %p1619_p9 }
 0x34b   : > { %1627 = shalt.err (!%p1624_p13)
}
 0x34c   : > { %1530 = dma.vmem_to_hbm [thread:$0]  (%p1742_p4), %s1214_s6, 128, %s1211_s16, %s1200_s18  }
 0x34d PF: > { %p1536_p0 = scmp.ge.s32.totalorder %s1680_s14, 2  ;;  %s1225_s3 = sand.u32 1, %s1660_s9  }
 0x34e   : > { %s1226_s4 = scalar_lea.sflag [#allocation5], %s1225_s3 }
 0x34f   : > { %p1533_p1 = pnand %p1536_p0, %p1749_p8 }
 0x351   : > { %p1534_p2 = pneg %p1533_p1 }
 0x353   : > { %1655 = dma.done.wait (%p1534_p2), %s1226_s4, 128  }
 0x354   : > { %1657 = vsyncadd (%p1534_p2), %s1226_s4, 4294967168  ;;  %s15_s14 = sadd.s32 1, %s1680_s14   ;;  %s2107_s9 = smov %s1664_s10 }
 0x355   : > { %p12_p3 = scmp.ge.s32.totalorder %s15_s14, 4   ;;  %s2108_s10 = smov %s1668_s11 }
 0x356   : > { %s2109_s11 = smov %s1755_s22  ;;  %s2110_s12 = smov %s1676_s13 }
 0x357   : > { %s2111_s13 = smov %s2113_s17  ;;  %14 = sbr.rel (!%p12_p3) target bundleno = 4 (0x4), region = 105 }
 0x35c   :  { %1231 = vsyncpa [#allocation5], 1 }
 0x35d   :  { %1233 = vsyncpa [#allocation5 + $0x1], 1 }
 0x35e   :  { %1234 = vsyncmov [#allocation3] }
 0x361   :  { %s1235_s19 = vpop.sfrf %1234 }
 0x362   :  { %p1402_p4 = scmp.ne.s32.totalorder %s1235_s19, 0 }
 0x364   :  { %1239 = shalt.err (%p1402_p4)  }

</bundles_post_ra>
